<compile_context>
chip_gen: v7x
topology: tpu7x:2x2x1
jax: 0.10.0
libtpu: 0.0.40
codegen_flags: <defaults>
</compile_context>

<pallas_src>
import math

import jax
import jax.numpy as jnp
from jax.experimental import pallas as pl
from jax.experimental.pallas import tpu as pltpu


# ----------------------------- kernel ---------------------------------------

def _cat_linear_kernel(x1_ref, x2_ref, w1_ref, w2_ref, b_ref, o_ref):
    # x1_ref: (tm, P*c1), x2_ref: (tm, P*c2) in their native (f32) dtype.
    # Cast on the VPU (free under DMA), then two MXU dots into one f32 accumulator.
    x1 = x1_ref[...].astype(w1_ref.dtype)
    x2 = x2_ref[...].astype(w2_ref.dtype)
    acc = jnp.dot(x1, w1_ref[...], preferred_element_type=jnp.float32)
    acc = acc + jnp.dot(x2, w2_ref[...], preferred_element_type=jnp.float32)
    o_ref[...] = (acc + b_ref[...]).astype(o_ref.dtype)


# ----------------------------- helpers --------------------------------------

def _pack_factor(c1, c2):
    """Smallest P (power of two) with P*c1 and P*c2 both multiples of 128."""
    p1 = 128 // math.gcd(128, c1)
    p2 = 128 // math.gcd(128, c2)
    return (p1 * p2) // math.gcd(p1, p2)


def _block_diag(wt, p):
    """(c, cout) -> (p*c, p*cout) block-diagonal matrix with p copies of wt."""
    c, cout = wt.shape
    eye = jnp.eye(p, dtype=wt.dtype)
    return jnp.einsum("pq,ij->piqj", eye, wt).reshape(p * c, p * cout)


def _vmem_capacity_bytes():
    try:
        info = pltpu.get_tpu_info()
        cap = getattr(info, "vmem_capacity_bytes", None)
        if cap:
            return int(cap)
    except Exception:
        pass
    return 64 * 1024 * 1024  # conservative (v7x per-TensorCore physical VMEM)


# ----------------------------- forward --------------------------------------

def cat_tensor_forward(x1, x2, weight, bias, *, compute_dtype=jnp.bfloat16,
                       out_dtype=None):
    """Pallas implementation of catTensor.forward.

    x1: (b, c1, h, w) NCHW;  x2: (b, c2, h, w) NCHW
    weight: (outchannel, c1 + c2)  (PyTorch nn.Linear layout);  bias: (outchannel,)
    Returns (catx, h, w) with catx of shape (b, h*w, outchannel).

    compute_dtype: matmul input dtype (weights + in-kernel activation cast).
    out_dtype:     output dtype (defaults to compute_dtype, i.e. bf16 writeback;
                   pass jnp.float32 if the consumer needs full precision).
    """
    b1, c1, h1, wid1 = x1.shape
    b2, c2, h2, wid2 = x2.shape
    assert b1 == b2 and h1 == h2 and wid1 == wid2
    h, w = int(h1), int(wid1)
    n = h * w
    m = b1 * n
    cout = weight.shape[0]
    out_dtype = compute_dtype if out_dtype is None else out_dtype

    # torch .view(b, -1, c): pure row-major reshape of NCHW memory (no transpose).
    x1_rows = jnp.reshape(x1, (m, c1))
    x2_rows = jnp.reshape(x2, (m, c2))

    in_bytes = jnp.dtype(x1.dtype).itemsize
    out_bytes = jnp.dtype(out_dtype).itemsize
    w_bytes_elem = jnp.dtype(compute_dtype).itemsize

    # ---- generation-aware VMEM budget ---------------------------------------
    cap = _vmem_capacity_bytes()
    usable = (cap * 3) // 4                      # headroom for compiler scratch

    # ---- lane-dense pack factor, capped by the weight's VMEM footprint ------
    p = _pack_factor(c1, c2)
    while p > 1 and 2 * p * (c1 + c2) * p * cout * w_bytes_elem > usable // 2:
        p //= 2                                  # guard: block-diag weight grows as p^2

    # Pad rows only when m is not a multiple of p (<= p-1 rows; rare path).
    m_pad = ((m + p - 1) // p) * p
    if m_pad != m:
        x1_rows = jnp.pad(x1_rows, ((0, m_pad - m), (0, 0)))
        x2_rows = jnp.pad(x2_rows, ((0, m_pad - m), (0, 0)))
    mp = m_pad // p

    # Packed, lane-dense views (free row-major reshapes; no dtype cast here).
    x1_p = jnp.reshape(x1_rows, (mp, p * c1))
    x2_p = jnp.reshape(x2_rows, (mp, p * c2))

    w1_blk = _block_diag(jnp.transpose(weight[:, :c1]), p).astype(compute_dtype)
    w2_blk = _block_diag(jnp.transpose(weight[:, c1:]), p).astype(compute_dtype)
    bias_p = jnp.reshape(jnp.tile(bias.astype(jnp.float32), p), (1, p * cout))

    # ---- row tiling / grid ---------------------------------------------------
    ws_weights = 2 * p * (c1 + c2) * p * cout * w_bytes_elem   # double-buffered
    ws_bias = 2 * p * cout * 4
    budget = usable - ws_weights - ws_bias - (2 * 1024 * 1024)
    per_row = p * (c1 + c2) * in_bytes + p * cout * out_bytes  # per packed row
    max_tmp = max(8, (budget // (2 * per_row)) // 8 * 8)       # double-buffered tiles

    if mp <= 8:
        tmp = mp                                  # block dim == full array dim is legal
    else:
        steps = pl.cdiv(mp, max_tmp)              # min steps that fit VMEM
        steps = max(steps, 2)                     # >= 2 so both v7x TCs get work
        if steps % 2:
            steps += 1                            # balanced across the 2 TensorCores
        tmp = min(max_tmp, ((pl.cdiv(mp, steps) + 7) // 8) * 8)
        tmp = max(tmp, 8)
    grid_rows = pl.cdiv(mp, tmp)                  # ragged last block handled by Pallas

    cost = pl.CostEstimate(
        flops=int(2 * m * (c1 + c2) * cout),
        transcendentals=0,
        bytes_accessed=int(mp * p * (c1 + c2) * in_bytes
                           + p * (c1 + c2) * p * cout * w_bytes_elem
                           + p * cout * 4
                           + mp * p * cout * out_bytes),
    )

    out_p = pl.pallas_call(
        _cat_linear_kernel,
        out_shape=jax.ShapeDtypeStruct((mp, p * cout), out_dtype),
        grid_spec=pltpu.PrefetchScalarGridSpec(
            num_scalar_prefetch=0,
            grid=(grid_rows,),
            in_specs=[
                pl.BlockSpec((tmp, p * c1), lambda i: (i, 0)),
                pl.BlockSpec((tmp, p * c2), lambda i: (i, 0)),
                pl.BlockSpec((p * c1, p * cout), lambda i: (0, 0)),
                pl.BlockSpec((p * c2, p * cout), lambda i: (0, 0)),
                pl.BlockSpec((1, p * cout), lambda i: (0, 0)),
            ],
            out_specs=pl.BlockSpec((tmp, p * cout), lambda i: (i, 0)),
        ),
        compiler_params=pltpu.CompilerParams(
            dimension_semantics=("parallel",),
            vmem_limit_bytes=int(usable),
        ),
        cost_estimate=cost,
    )(x1_p, x2_p, w1_blk, w2_blk, bias_p)

    # (mp, p*cout) is a free row-major view of (m_pad, cout).
    out_rows = jnp.reshape(out_p, (m_pad, cout))
    if m_pad != m:
        out_rows = out_rows[:m]                   # rare path only
    catx = jnp.reshape(out_rows, (b1, n, cout))
    return catx, h, w


def init_params(key, inchannel, outchannel, dtype=jnp.float32):
    # Deterministic synthetic init matching nn.Linear(inchannel, outchannel) shapes.
    kw, kb = jax.random.split(key)
    bound = 1.0 / float(math.sqrt(inchannel))
    weight = jax.random.uniform(kw, (outchannel, inchannel), dtype,
                                minval=-bound, maxval=bound)
    bias = jax.random.uniform(kb, (outchannel,), dtype,
                              minval=-bound, maxval=bound)
    return weight, bias


if __name__ == "__main__":
    key = jax.random.PRNGKey(0)
    k1, k2, kp = jax.random.split(key, 3)

    b, c1, c2, h, w = 2, 4, 4, 16, 16
    outchannel = 32
    inchannel = c1 + c2

    x1 = jax.random.normal(k1, (b, c1, h, w), jnp.float32)
    x2 = jax.random.normal(k2, (b, c2, h, w), jnp.float32)
    weight, bias = init_params(kp, inchannel, outchannel)

    catx, oh, ow = cat_tensor_forward(x1, x2, weight, bias)
    catx = jax.block_until_ready(catx)

    # Reference (same semantics as the PyTorch module: NCHW .view, no permute).
    x1_v = jnp.reshape(x1, (b, h * w, c1))
    x2_v = jnp.reshape(x2, (b, h * w, c2))
    xin = jnp.concatenate([x1_v, x2_v], axis=-1)
    ref_f32 = xin @ weight.T + bias
    # Reference with the kernel's bf16 input/weight rounding (f32 accumulation).
    xin_bf = xin.astype(jnp.bfloat16).astype(jnp.float32)
    w_bf = weight.astype(jnp.bfloat16).astype(jnp.float32)
    ref_bf = xin_bf @ w_bf.T + bias

    got = catx.astype(jnp.float32)
    assert catx.shape == (b, h * w, outchannel)
    assert catx.dtype == jnp.bfloat16          # bf16 writeback by default
    assert isinstance(oh, int) and isinstance(ow, int)
    assert (oh, ow) == (h, w)
    assert jnp.allclose(got, ref_bf, atol=5e-2, rtol=5e-2)
    assert jnp.allclose(got, ref_f32, atol=1e-1, rtol=1e-1)

    print("KERNEL_OK")
</pallas_src>

<mosaic_0001>
module attributes {stable_mosaic.version = 11 : i64} {
  func.func @_cat_linear_kernel(%arg0: i32, %arg1: memref<8x128xf32, #tpu.memory_space<vmem>>, %arg2: memref<8x128xf32, #tpu.memory_space<vmem>>, %arg3: memref<128x1024xbf16, #tpu.memory_space<vmem>>, %arg4: memref<128x1024xbf16, #tpu.memory_space<vmem>>, %arg5: memref<1x1024xf32, #tpu.memory_space<vmem>>, %arg6: memref<8x1024xbf16, #tpu.memory_space<vmem>>) attributes {dimension_semantics = [#tpu.dimension_semantics<parallel>], iteration_bounds = array<i64: 2>, scalar_prefetch = 0 : i64, scratch_operands = 0 : i64, tpu.core_type = #tpu.core_type<tc>, window_params = [{transform_indices = @transform_0, window_bounds = array<i64: 8, 128>}, {transform_indices = @transform_1, window_bounds = array<i64: 8, 128>}, {pipeline_mode = #tpu.pipeline_mode<synchronous>, transform_indices = @transform_2, window_bounds = array<i64: 128, 1024>}, {pipeline_mode = #tpu.pipeline_mode<synchronous>, transform_indices = @transform_3, window_bounds = array<i64: 128, 1024>}, {pipeline_mode = #tpu.pipeline_mode<synchronous>, transform_indices = @transform_4, window_bounds = array<i64: 1, 1024>}, {transform_indices = @transform_5, window_bounds = array<i64: 8, 1024>}]} {
    %c0 = arith.constant 0 : index
    %c0_0 = arith.constant 0 : index
    %0 = vector.load %arg1[%c0, %c0_0] : memref<8x128xf32, #tpu.memory_space<vmem>>, vector<8x128xf32>
    %1 = arith.truncf %0 : vector<8x128xf32> to vector<8x128xbf16>
    %c0_1 = arith.constant 0 : index
    %c0_2 = arith.constant 0 : index
    %2 = vector.load %arg2[%c0_1, %c0_2] : memref<8x128xf32, #tpu.memory_space<vmem>>, vector<8x128xf32>
    %3 = arith.truncf %2 : vector<8x128xf32> to vector<8x128xbf16>
    %c0_3 = arith.constant 0 : index
    %c0_4 = arith.constant 0 : index
    %4 = vector.load %arg3[%c0_3, %c0_4] : memref<128x1024xbf16, #tpu.memory_space<vmem>>, vector<128x1024xbf16>
    %cst = arith.constant dense<0.000000e+00> : vector<8x1024xf32>
    %5 = tpu.matmul %1, %4, %cst {dimension_numbers = #tpu.dot_dimension_numbers<[1], [0], [0], [1], [0, 0, 1, 1], [], []>} : vector<8x128xbf16>, vector<128x1024xbf16>, vector<8x1024xf32> -> vector<8x1024xf32>
    %c0_5 = arith.constant 0 : index
    %c0_6 = arith.constant 0 : index
    %6 = vector.load %arg4[%c0_5, %c0_6] : memref<128x1024xbf16, #tpu.memory_space<vmem>>, vector<128x1024xbf16>
    %cst_7 = arith.constant dense<0.000000e+00> : vector<8x1024xf32>
    %7 = tpu.matmul %3, %6, %cst_7 {dimension_numbers = #tpu.dot_dimension_numbers<[1], [0], [0], [1], [0, 0, 1, 1], [], []>} : vector<8x128xbf16>, vector<128x1024xbf16>, vector<8x1024xf32> -> vector<8x1024xf32>
    %8 = arith.addf %5, %7 : vector<8x1024xf32>
    %c0_8 = arith.constant 0 : index
    %c0_9 = arith.constant 0 : index
    %9 = vector.load %arg5[%c0_8, %c0_9] : memref<1x1024xf32, #tpu.memory_space<vmem>>, vector<1x1024xf32>
    %10 = vector.broadcast %9 : vector<1x1024xf32> to vector<8x1024xf32>
    %11 = arith.addf %8, %10 : vector<8x1024xf32>
    %12 = arith.truncf %11 : vector<8x1024xf32> to vector<8x1024xbf16>
    %c0_10 = arith.constant 0 : index
    %c0_11 = arith.constant 0 : index
    %13 = vector.load %arg6[%c0_10, %c0_11] : memref<8x1024xbf16, #tpu.memory_space<vmem>>, vector<8x1024xbf16>
    tpu.vector_store %arg6[%c0_10, %c0_11], %12 {strides = array<i32>} : memref<8x1024xbf16, #tpu.memory_space<vmem>>, vector<8x1024xbf16>,
    return
  }
  func.func @transform_0(%arg0: i32) -> (i32, i32) {
    %c0_i32 = arith.constant 0 : i32
    %c0_i32_0 = arith.constant 0 : i32
    return %arg0, %c0_i32 : i32, i32
  }
  func.func @transform_1(%arg0: i32) -> (i32, i32) {
    %c0_i32 = arith.constant 0 : i32
    %c0_i32_0 = arith.constant 0 : i32
    return %arg0, %c0_i32 : i32, i32
  }
  func.func @transform_2(%arg0: i32) -> (i32, i32) {
    %c0_i32 = arith.constant 0 : i32
    %c0_i32_0 = arith.constant 0 : i32
    %c0_i32_1 = arith.constant 0 : i32
    return %c0_i32, %c0_i32_0 : i32, i32
  }
  func.func @transform_3(%arg0: i32) -> (i32, i32) {
    %c0_i32 = arith.constant 0 : i32
    %c0_i32_0 = arith.constant 0 : i32
    %c0_i32_1 = arith.constant 0 : i32
    return %c0_i32, %c0_i32_0 : i32, i32
  }
  func.func @transform_4(%arg0: i32) -> (i32, i32) {
    %c0_i32 = arith.constant 0 : i32
    %c0_i32_0 = arith.constant 0 : i32
    %c0_i32_1 = arith.constant 0 : i32
    return %c0_i32, %c0_i32_0 : i32, i32
  }
  func.func @transform_5(%arg0: i32) -> (i32, i32) {
    %c0_i32 = arith.constant 0 : i32
    %c0_i32_0 = arith.constant 0 : i32
    return %arg0, %c0_i32 : i32, i32
  }
}

</mosaic_0001>

<bundles_post_ra>
// kernel: tpu_custom_call.1
= control target key start
LH: loop header
LB: loop body
LE: loop exit
PB: predicated region body
PF: predicated region fallthrough
CT: control target
= control target key end

     0   :  { %s2392_s0 = inlined_call_operand.hbm [shape: f32[16,128], index: 0, kind: input, shape index: {}]   ;;  %s2393_s1 = inlined_call_operand.hbm [shape: f32[16,128], index: 1, kind: input, shape index: {}]   ;;  %s2394_s2 = inlined_call_operand.hbm [shape: bf16[128,1024], index: 2, kind: input, shape index: {}]   ;;  %s2395_s3 = inlined_call_operand.hbm [shape: bf16[128,1024], index: 3, kind: input, shape index: {}]   ;;  %s2396_s4 = inlined_call_operand.vmem [shape: f32[1,1024], index: 4, kind: input, shape index: {}]   ;;  %s2397_s5 = inlined_call_operand.hbm [shape: bf16[16,1024], index: 5, kind: output, shape index: {}]  }
   0x1   :  { %2402 = sst [smem:[#allocation16_spill]] %s2394_s2 }
   0x2   :  { %2403 = sst [smem:[#allocation17_spill]] %s2395_s3 }
   0x3   :  { %10 = vsyncpa [#allocation3], 0 }
   0x4   :  { %12 = vsyncpa [#allocation3 + $0x1], 0 }
   0x5   :  { %13 = vsyncpa [#allocation6], 0 }
   0x6   :  { %15 = vsyncpa [#allocation6 + $0x1], 0 }
   0x7   :  { %16 = vsyncpa [#allocation9], 0 }
   0x8   :  { %17 = vsyncpa [#allocation4], 0 }
   0x9   :  { %19 = vsyncpa [#allocation4 + $0x1], 0  ;;  %s2086_s18 = smov 0   ;;  %s2088_s19 = smov 0  }
   0xa   :  { %s2090_s20 = smov 0   ;;  %s2092_s21 = smov 0  }
   0xb LB: > { %s2107_s22 = sadd.s32 4294967295, %s2046_s21   ;;  %s1620_s23 = sadd.s32 4294967294, %s2046_s21   ;;  %s2046_s21 = sphi %s2092_s21, %s2425_s21   ;;  %s2042_s20 = sphi %s2090_s20, %s2424_s20   ;;  %s2038_s19 = sphi %s2088_s19, %s2423_s19   ;;  %s2034_s18 = sphi %s2086_s18, %s2422_s18  }
   0xc   : > { %p45_p0 = scmp.ne.s32.totalorder %s2038_s19, %s2034_s18  ;;  %p2398_p1 = scmp.eq.s32.totalorder %s2107_s22, 0 }
   0xd   : > { %p164_p3 = scmp.eq.s32.totalorder %s1620_s23, 1  ;;  %p1621_p5 = scmp.ge.s32.totalorder %s2046_s21, 1 }
   0xe   : > { %p2116_p4 = por %p2398_p1, %p45_p0  ;;  %p171_p7 = scmp.lt.s32.totalorder %s2046_s21, 3 }
   0xf   : > { %p2121_p6 = por %p164_p3, %p45_p0  ;;  %s2048_s27 = smov [#allocation7]  }
  0x10   : > { %s2404_s24 = scalar_select %p2116_p4, 1, 0 }
  0x11   : > { %s2405_s25 = scalar_select %p2121_p6, 1, 0 }
  0x12   : > { %p2126_p8 = pnand %p1621_p5, %p171_p7  ;;  %s183_s28 = sshll.u32 %s2048_s27, 4  ;;  %s2130_s28 = int_to_ptr.vmem [resolvable:$true] %s183_s28 }
  0x13   : > { %s2049_s30 = smov [#allocation8]   ;;  %s2408_s2 = sld [smem:[#allocation16_spill]] }
  0x14   : > { %s2406_s26 = scalar_select %p2126_p8, 1, 0 }
  0x15   : > { %p1791_p9 = pneg %p2126_p8  ;;  %s196_s6 = sshll.u32 %s2049_s30, 4  ;;  %s2141_s6 = int_to_ptr.vmem [resolvable:$true] %s196_s6 }
  0x17   : > { %p2137_p11 = pnand %p1791_p9, %p2398_p1 }
  0x19   : > { %s1852_s9 = scalar_lea.hbm %s2408_s2, 8192  ;;  %p1854_p13 = pneg %p2137_p11 }
  0x1a   : > { %p1853_p12 = scmp.ne.s32.totalorder %s2408_s2, %s1852_s9  ;;  %p1859_p5 = scmp.lt.u32.totalorder %s1852_s9, %s2408_s2 }
  0x1c   : > { %p1855_p0 = pnand %p1854_p13, %p1853_p12 }
  0x1e   : > { %p1856_p3 = pneg %p1855_p0 }
  0x20   : > { %p1861_p7 = pnand %p1859_p5, %p1856_p3 }
  0x22   : > { %1864 = shalt.err (!%p1861_p7)
}
  0x23   : > { %s1865_s14 = scalar_lea.vmem %s2130_s28, 8192  ;;  %p1873_p2 = scmp.lt.s32.totalorder %s2130_s28, %s2130_s28 }
  0x24   : > { %p1866_p9 = scmp.ne.s32.totalorder %s2130_s28, %s1865_s14  ;;  %p1874_p12 = scmp.lt.s32.totalorder %s1865_s14, %s1865_s14 }
  0x26   : > { %p1868_p10 = pnand %p1866_p9, %p1854_p13  ;;  %p1875_p0 = por %p1874_p12, %p1873_p2 }
  0x28   : > { %p1869_p1 = pneg %p1868_p10 }
  0x2a   : > { %p1876_p6 = pnand %p1875_p0, %p1869_p1 }
  0x2c   : > { %1879 = shalt.err (!%p1876_p6)
}
  0x2d   : > { %s2050_s15 = smov 512   ;;  %s2051_s16 = smov 32  }
  0x2e   : > { %1794 = dma.hbm_to_vmem [thread:$0]  (!%p2137_p11), %s2408_s2, 8192, %s2130_s28, [#allocation6], %s2050_s15, %s2050_s15, %s2051_s16  }
  0x2f   : > { %s2409_s3 = sld [smem:[#allocation17_spill]] }
  0x35   : > { %s1880_s7 = scalar_lea.hbm %s2409_s3, 8192 }
  0x36   : > { %p1881_p2 = scmp.ne.s32.totalorder %s2409_s3, %s1880_s7  ;;  %p1887_p10 = scmp.lt.u32.totalorder %s1880_s7, %s2409_s3 }
  0x38   : > { %p1883_p1 = pnand %p1881_p2, %p1854_p13 }
  0x3a   : > { %p1884_p6 = pneg %p1883_p1 }
  0x3c   : > { %p1889_p3 = pnand %p1887_p10, %p1884_p6 }
  0x3e   : > { %1892 = shalt.err (!%p1889_p3)
}
  0x3f   : > { %s1893_s28 = scalar_lea.vmem %s2141_s6, 8192  ;;  %p1901_p12 = scmp.lt.s32.totalorder %s2141_s6, %s2141_s6 }
  0x40   : > { %p1894_p5 = scmp.ne.s32.totalorder %s2141_s6, %s1893_s28  ;;  %p1902_p0 = scmp.lt.s32.totalorder %s1893_s28, %s1893_s28 }
  0x42   : > { %p1896_p7 = pnand %p1894_p5, %p1854_p13  ;;  %p1903_p2 = por %p1902_p0, %p1901_p12 }
  0x44   : > { %p1897_p9 = pneg %p1896_p7 }
  0x46   : > { %p1904_p1 = pnand %p1903_p2, %p1897_p9 }
  0x48   : > { %1907 = shalt.err (!%p1904_p1)
}
  0x49   : > { %1797 = dma.hbm_to_vmem [thread:$0]  (!%p2137_p11), %s2409_s3, 8192, %s2141_s6, [#allocation9], %s2050_s15, %s2050_s15, %s2051_s16  }
  0x4a   : > { %s2196_s14 = sadd.s32 1, %s2046_s21   ;;  %s32_s29 = sadd.s32 1, %s2042_s20 }
  0x4b   : > { %s29_s17 = ssub.s32 %s2046_s21, %s2196_s14  ;;  %p39_p13 = scmp.ne.s32.totalorder %s2042_s20, %s2038_s19 }
  0x4c   : > { %p30_p6 = scmp.eq.s32.totalorder %s29_s17, 0  ;;  %p40_p10 = scmp.eq.s32.totalorder %s2046_s21, 0 }
  0x4d   : > { %p2410_p3 = scmp.eq.s32.totalorder %s2107_s22, 1  ;;  %p1811_p7 = scmp.lt.s32.totalorder %s2046_s21, 2 }
  0x4e   : > { %s2212_s27 = scalar_select %p30_p6, %s2042_s20, %s32_s29  }
  0x4f   : > { %p2206_p5 = por %p2410_p3, %p39_p13  ;;  %p41_p9 = por %p40_p10, %p39_p13 }
  0x50   : > { %s213_s30 = sand.u32 1, %s2042_s20   ;;  %s1626_s15 = sshll.u32 %s2046_s21, 7 }
  0x51   : > { %s2411_s23 = scalar_select %p2206_p5, 1, 0 }
  0x52   : > { %s2215_s6 = sshll.u32 %s213_s30, 3  ;;  %s2221_s8 = scalar_lea.hbm %s2392_s0, %s1626_s15 }
  0x53   : > { %s217_s9 = scalar_lea.vmem [#allocation2], %s2215_s6  ;;  %p2226_p11 = pnand %p1811_p7, %p41_p9 }
  0x54   : > { %s224_s10 = sshll.u32 %s217_s9, 4  ;;  %s2233_s13 = scalar_lea.hbm %s2393_s1, %s1626_s15  ;;  %s2224_s10 = int_to_ptr.vmem [resolvable:$true] %s224_s10 }
  0x55   : > { %s231_s29 = sand.u32 1, %s2046_s21   ;;  %s214_s17 = scalar_lea.sflag [#allocation3], %s213_s30 }
  0x56   : > { %s1908_s16 = scalar_lea.hbm %s2221_s8, 128  ;;  %p1910_p0 = pneg %p2226_p11 }
  0x57   : > { %p1909_p12 = scmp.ne.s32.totalorder %s2221_s8, %s1908_s16  ;;  %s1913_s2 = scalar_lea.hbm %s2392_s0, 256 }
  0x58   : > { %p1914_p13 = scmp.lt.u32.totalorder %s2221_s8, %s2392_s0  ;;  %p1915_p6 = scmp.lt.u32.totalorder %s1913_s2, %s1908_s16 }
  0x59   : > { %p1911_p2 = pnand %p1910_p0, %p1909_p12  ;;  %p1917_p3 = scmp.lt.u32.totalorder %s1908_s16, %s2221_s8 }
  0x5a   : > { %p1916_p10 = por %p1915_p6, %p1914_p13 }
  0x5b   : > { %p1912_p1 = pneg %p1911_p2 }
  0x5c   : > { %p1918_p7 = por %p1917_p3, %p1916_p10 }
  0x5e   : > { %p1919_p9 = pnand %p1918_p7, %p1912_p1 }
  0x60   : > { %1922 = shalt.err (!%p1919_p9)
}
  0x61   : > { %s1923_s30 = scalar_lea.vmem %s2224_s10, 128  ;;  %s2052_s15 = smov [#allocation2]  }
  0x62   : > { %p1924_p12 = scmp.ne.s32.totalorder %s2224_s10, %s1923_s30  ;;  %s1928_s12 = sshll.u32 %s2052_s15, 4  ;;  %s1929_s12 = int_to_ptr.vmem [resolvable:$false] %s1928_s12 }
  0x63   : > { %s1930_s3 = scalar_lea.vmem %s1929_s12, 256  ;;  %p1931_p4 = scmp.lt.s32.totalorder %s2224_s10, %s1929_s12 }
  0x64   : > { %p1926_p2 = pnand %p1924_p12, %p1910_p0  ;;  %p1932_p13 = scmp.lt.s32.totalorder %s1930_s3, %s1923_s30 }
  0x66   : > { %p1927_p5 = pneg %p1926_p2  ;;  %p1933_p6 = por %p1932_p13, %p1931_p4 }
  0x68   : > { %p1934_p10 = pnand %p1933_p6, %p1927_p5 }
  0x6a   : > { %1937 = shalt.err (!%p1934_p10)
}
  0x6b   : > { %1801 = dma.hbm_to_vmem [thread:$0]  (!%p2226_p11), %s2221_s8, 128, %s2224_s10, %s214_s17  }
  0x6c   : > { %s235_s2 = scalar_lea.vmem [#allocation5], %s2215_s6  ;;  %s232_s7 = scalar_lea.sflag [#allocation6], %s231_s29 }
  0x6d   : > { %s242_s16 = sshll.u32 %s235_s2, 4  ;;  %s1938_s9 = scalar_lea.hbm %s2233_s13, 128  ;;  %s243_s16 = int_to_ptr.vmem [resolvable:$true] %s242_s16 }
  0x6e   : > { %p1939_p4 = scmp.ne.s32.totalorder %s2233_s13, %s1938_s9  ;;  %s1943_s15 = scalar_lea.hbm %s2393_s1, 256 }
  0x6f   : > { %p1944_p3 = scmp.lt.u32.totalorder %s2233_s13, %s2393_s1  ;;  %p1945_p7 = scmp.lt.u32.totalorder %s1943_s15, %s1938_s9 }
  0x70   : > { %p1941_p5 = pnand %p1939_p4, %p1910_p0  ;;  %p1947_p12 = scmp.lt.u32.totalorder %s1938_s9, %s2233_s13 }
  0x71   : > { %p1946_p9 = por %p1945_p7, %p1944_p3 }
  0x72   : > { %p1942_p1 = pneg %p1941_p5 }
  0x73   : > { %p1948_p2 = por %p1947_p12, %p1946_p9 }
  0x75   : > { %p1949_p13 = pnand %p1948_p2, %p1942_p1 }
  0x77   : > { %1952 = shalt.err (!%p1949_p13)
}
  0x78   : > { %s1953_s6 = scalar_lea.vmem %s243_s16, 128  ;;  %s2053_s8 = smov [#allocation5]  }
  0x79   : > { %p1954_p6 = scmp.ne.s32.totalorder %s243_s16, %s1953_s6  ;;  %s1958_s10 = sshll.u32 %s2053_s8, 4  ;;  %s1959_s10 = int_to_ptr.vmem [resolvable:$false] %s1958_s10 }
  0x7a   : > { %s1960_s29 = scalar_lea.vmem %s1959_s10, 256  ;;  %p1961_p5 = scmp.lt.s32.totalorder %s243_s16, %s1959_s10 }
  0x7b   : > { %p1956_p10 = pnand %p1954_p6, %p1910_p0  ;;  %p1962_p8 = scmp.lt.s32.totalorder %s1960_s29, %s1953_s6 }
  0x7d   : > { %p1957_p4 = pneg %p1956_p10  ;;  %p1963_p3 = por %p1962_p8, %p1961_p5 }
  0x7f   : > { %p1964_p7 = pnand %p1963_p3, %p1957_p4 }
  0x81   : > { %1967 = shalt.err (!%p1964_p7)
}
  0x82   : > { %1804 = dma.hbm_to_vmem [thread:$0]  (!%p2226_p11), %s2233_s13, 128, %s243_s16, %s232_s7  }
  0x83   : > { %p2413_p1 = scmp.ne.s32.totalorder %s2406_s26, 0 }
  0x84   : > { %s2286_s17 = sand.u32 (!%p2413_p1), 1, %s2038_s19   ;;  %p2414_p8 = scmp.ne.s32.totalorder (!%p2413_p1), %s2404_s24, 0 }
  0x85   : > { %251 = sbr.rel (%p2413_p1) target bundleno = 516 (0x204), region = 40  ;;  %s1630_s2 = sshll.u32 (!%p2413_p1), %s2286_s17, 3 }
  0x86   : > { %s254_s9 = scalar_lea.sflag (!%p2413_p1), [#allocation3], %s2286_s17  ;;  %s2290_s28 = scalar_lea.vmem (!%p2413_p1), [#allocation2], %s1630_s2 }
  0x8c   : > { %2013 = dma.done.wait (%p2414_p8), %s254_s9, 128  }
  0x8d   : > { %2015 = vsyncadd (%p2414_p8), %s254_s9, 4294967168  ;;  %s262_s11 = sand.u32 1, %s2107_s22   ;;  %s2297_s13 = scalar_lea.vmem [#allocation5], %s1630_s2 }
  0x8e   : > { %s263_s26 = scalar_lea.sflag [#allocation6], %s262_s11 }
  0x8f   : > { %2017 = dma.done.wait (%p2414_p8), %s263_s26, 128  }
  0x90   : > { %2019 = vsyncadd (%p2414_p8), %s263_s26, 4294967168  ;;  %p2415_p11 = scmp.eq.s32.totalorder %s2107_s22, 0 }
  0x92   : > { %2021 = dma.done.wait (%p2415_p11), [#allocation6], 8192   ;;  %p2416_p0 = pmov %p2415_p11 }
  0x94   : > { %2023 = vsyncadd (%p2416_p0), [#allocation6], 4294959104  ;;  %p2417_p9 = pmov %p2416_p0 }
  0x95   : > { %p2418_p12 = pmov %p2416_p0 }
  0x96   : > { %2025 = dma.done.wait (%p2417_p9), [#allocation9], 8192  }
  0x97   : > { %2027 = vsyncadd (%p2418_p12), [#allocation9], 4294959104  ;;  %v2054_v0 = vmov 0   ;;  %v375_v1 = vld [vmem:[#allocation8] sm:$0xff]  ;;  %v376_v3 = vld [vmem:[#allocation8 + $0x8] sm:$0xff]  ;;  %s1634_s7 = sshll.u32 %s2286_s17, 5 }
  0x98   : > { %791 = vmatprep.mubr.bf16.mxu0 %v2054_v0  ;;  %832 = vmatprep.mubr.bf16.mxu1 %v2054_v0  ;;  %v379_v2 = vld [vmem:[#allocation8 + $0x20] sm:$0xff]  ;;  %v380_v5 = vld [vmem:[#allocation8 + $0x28] sm:$0xff]  ;;  %v377_v63 = vld [vmem:[#allocation8 + $0x10] sm:$0xff]  ;;  %s2337_s30 = scalar_lea.vmem [#allocation10], %s1634_s7  ;;  %s1776_s15 = sshll.u32 %s2107_s22, 9 }
  0x99   : > { %v1636_v4 = vcombine.high %v375_v1, %v379_v2  ;;  %v1635_v6 = vcombine.low %v375_v1, %v379_v2  ;;  %v383_v7 = vld [vmem:[#allocation8 + $0x40] sm:$0xff]  ;;  %v1638_v9 = vcombine.high %v376_v3, %v380_v5  ;;  %v1637_v10 = vcombine.low %v376_v3, %v380_v5  ;;  %v384_v12 = vld [vmem:[#allocation8 + $0x48] sm:$0xff]  ;;  %v381_v1 = vld [vmem:[#allocation8 + $0x30] sm:$0xff]  ;;  %s1508_s12 = sshll.u32 %s2337_s30, 4  ;;  %s2346_s8 = scalar_lea.hbm %s2397_s5, %s1776_s15  ;;  %s2348_s12 = int_to_ptr.vmem [resolvable:$true] %s1508_s12 }
  0x9a   : > { %v387_v8 = vld [vmem:[#allocation8 + $0x60] sm:$0xff]  ;;  %v388_v13 = vld [vmem:[#allocation8 + $0x68] sm:$0xff]  ;;  %v378_v2 = vld [vmem:[#allocation8 + $0x18] sm:$0xff]  ;;  %s1494_s10 = scalar_lea.sflag [#allocation4], %s2286_s17  ;;  %s1968_s29 = scalar_lea.vmem %s2348_s12, 512 }
  0x9b   : > { %v1644_v11 = vcombine.high %v383_v7, %v387_v8  ;;  %v391_v14 = vld [vmem:[#allocation8 + $0x80] sm:$0xff]  ;;  %759 = vmatprep.subr.bf16.mxu0 %v1636_v4  ;;  %v1646_v15 = vcombine.high %v384_v12, %v388_v13  ;;  %v392_v17 = vld [vmem:[#allocation8 + $0x88] sm:$0xff]  ;;  %800 = vmatprep.subr.bf16.mxu1 %v1638_v9  ;;  %v1643_v19 = vcombine.low %v383_v7, %v387_v8  ;;  %v382_v3 = vld [vmem:[#allocation8 + $0x38] sm:$0xff]  ;;  %p1969_p2 = scmp.ne.s32.totalorder %s2348_s12, %s1968_s29  ;;  %p2419_p13 = scmp.ne.s32.totalorder %s2411_s23, 0 }
  0x9c   : > { %v395_v16 = vld [vmem:[#allocation8 + $0xa0] sm:$0xff]  ;;  %v396_v18 = vld [vmem:[#allocation8 + $0xa8] sm:$0xff]  ;;  %760 = vmatpush1.bf16.msra.mxu0 %v1635_v6  ;;  %801 = vmatpush1.bf16.msra.mxu1 %v1637_v10  ;;  %v1645_v20 = vcombine.low %v384_v12, %v388_v13  ;;  %v309_v5 = vld [vmem:[%s2297_s13] sm:$0xff]  ;;  %v1640_v7 = vcombine.high %v377_v63, %v381_v1  ;;  %v1642_v8 = vcombine.high %v378_v2, %v382_v3  ;;  %s2055_s22 = smov [#allocation10]  }
  0x9d   : > { %761 = vmatprep.subr.bf16.mxu0 %v1644_v11  ;;  %v1652_v21 = vcombine.high %v391_v14, %v395_v16  ;;  %802 = vmatprep.subr.bf16.mxu1 %v1646_v15  ;;  %v1654_v22 = vcombine.high %v392_v17, %v396_v18  ;;  %v399_v23 = vld [vmem:[#allocation8 + $0xc0] sm:$0xff]  ;;  %v400_v25 = vld [vmem:[#allocation8 + $0xc8] sm:$0xff]  ;;  %v1651_v27 = vcombine.low %v391_v14, %v395_v16  ;;  %v385_v9 = vld [vmem:[#allocation8 + $0x50] sm:$0xff]  ;;  %p1970_p6 = pnand %p1969_p2, %p2419_p13  ;;  %s1972_s2 = sshll.u32 %s2055_s22, 4  ;;  %s1973_s2 = int_to_ptr.vmem [resolvable:$false] %s1972_s2 }
  0x9e   : > { %v403_v24 = vld [vmem:[#allocation8 + $0xe0] sm:$0xff]  ;;  %v404_v26 = vld [vmem:[#allocation8 + $0xe8] sm:$0xff]  ;;  %v1653_v28 = vcombine.low %v392_v17, %v396_v18  ;;  %v389_v10 = vld [vmem:[#allocation8 + $0x70] sm:$0xff]  ;;  %v2314_v11 = vpack.c.bf16 %v309_v5, %v309_v5  ;;  %v1639_v14 = vcombine.low %v377_v63, %v381_v1  ;;  %v1641_v15 = vcombine.low %v378_v2, %v382_v3  ;;  %s1974_s9 = scalar_lea.vmem %s1973_s2, 1024  ;;  %p1975_p4 = scmp.lt.s32.totalorder %s2348_s12, %s1973_s2 }
  0x9f   : > { %v1660_v29 = vcombine.high %v399_v23, %v403_v24  ;;  %v1662_v30 = vcombine.high %v400_v25, %v404_v26  ;;  %v407_v31 = vld [vmem:[#allocation8 + $0x100] sm:$0xff]  ;;  %v408_v33 = vld [vmem:[#allocation8 + $0x108] sm:$0xff]  ;;  %v1659_v35 = vcombine.low %v399_v23, %v403_v24  ;;  %v1661_v36 = vcombine.low %v400_v25, %v404_v26  ;;  %v386_v12 = vld [vmem:[#allocation8 + $0x58] sm:$0xff]  ;;  %p1971_p10 = pneg %p1970_p6  ;;  %p1976_p5 = scmp.lt.s32.totalorder %s1974_s9, %s1968_s29 }
  0xa0   : > { %762 = vmatpush1.bf16.msra.mxu0 %v1643_v19  ;;  %803 = vmatpush1.bf16.msra.mxu1 %v1645_v20  ;;  %v411_v32 = vld [vmem:[#allocation8 + $0x120] sm:$0xff]  ;;  %v412_v34 = vld [vmem:[#allocation8 + $0x128] sm:$0xff]  ;;  %v390_v13 = vld [vmem:[#allocation8 + $0x78] sm:$0xff]  ;;  %v1648_v16 = vcombine.high %v385_v9, %v389_v10 }
  0xa1   : > { %763 = vmatprep.subr.bf16.mxu0 %v1652_v21  ;;  %804 = vmatprep.subr.bf16.mxu1 %v1654_v22  ;;  %v1668_v37 = vcombine.high %v407_v31, %v411_v32  ;;  %v1670_v38 = vcombine.high %v408_v33, %v412_v34  ;;  %v415_v39 = vld [vmem:[#allocation8 + $0x140] sm:$0xff]  ;;  %v416_v41 = vld [vmem:[#allocation8 + $0x148] sm:$0xff]  ;;  %v1667_v43 = vcombine.low %v407_v31, %v411_v32  ;;  %v393_v18 = vld [vmem:[#allocation8 + $0x90] sm:$0xff]  ;;  %p1977_p3 = por %p1976_p5, %p1975_p4 }
  0xa2   : > { %v419_v40 = vld [vmem:[#allocation8 + $0x160] sm:$0xff]  ;;  %v420_v42 = vld [vmem:[#allocation8 + $0x168] sm:$0xff]  ;;  %v1669_v44 = vcombine.low %v408_v33, %v412_v34  ;;  %v1650_v17 = vcombine.high %v386_v12, %v390_v13  ;;  %v397_v19 = vld [vmem:[#allocation8 + $0xb0] sm:$0xff]  ;;  %v1647_v22 = vcombine.low %v385_v9, %v389_v10  ;;  %v1649_v23 = vcombine.low %v386_v12, %v390_v13 }
  0xa3   : > { %v1676_v45 = vcombine.high %v415_v39, %v419_v40  ;;  %v1678_v46 = vcombine.high %v416_v41, %v420_v42  ;;  %v423_v47 = vld [vmem:[#allocation8 + $0x180] sm:$0xff]  ;;  %v424_v49 = vld [vmem:[#allocation8 + $0x188] sm:$0xff]  ;;  %v1675_v51 = vcombine.low %v415_v39, %v419_v40  ;;  %v1677_v52 = vcombine.low %v416_v41, %v420_v42  ;;  %v394_v20 = vld [vmem:[#allocation8 + $0x98] sm:$0xff]  ;;  %p1978_p7 = pnand %p1977_p3, %p1971_p10 }
  0xa4   : > { %764 = vmatpush1.bf16.msra.mxu0 %v1651_v27  ;;  %805 = vmatpush1.bf16.msra.mxu1 %v1653_v28  ;;  %v427_v48 = vld [vmem:[#allocation8 + $0x1a0] sm:$0xff]  ;;  %v428_v50 = vld [vmem:[#allocation8 + $0x1a8] sm:$0xff]  ;;  %v398_v21 = vld [vmem:[#allocation8 + $0xb8] sm:$0xff]  ;;  %v1656_v24 = vcombine.high %v393_v18, %v397_v19 }
  0xa5   : > { %765 = vmatprep.subr.bf16.mxu0 %v1660_v29  ;;  %806 = vmatprep.subr.bf16.mxu1 %v1662_v30  ;;  %v1684_v53 = vcombine.high %v423_v47, %v427_v48  ;;  %v1686_v54 = vcombine.high %v424_v49, %v428_v50  ;;  %v431_v55 = vld [vmem:[#allocation8 + $0x1c0] sm:$0xff]  ;;  %v432_v57 = vld [vmem:[#allocation8 + $0x1c8] sm:$0xff]  ;;  %v1683_v59 = vcombine.low %v423_v47, %v427_v48  ;;  %v401_v26 = vld [vmem:[#allocation8 + $0xd0] sm:$0xff] }
  0xa6   : > { %v435_v56 = vld [vmem:[#allocation8 + $0x1e0] sm:$0xff]  ;;  %v436_v58 = vld [vmem:[#allocation8 + $0x1e8] sm:$0xff]  ;;  %v1685_v60 = vcombine.low %v424_v49, %v428_v50  ;;  %v1658_v25 = vcombine.high %v394_v20, %v398_v21  ;;  %v405_v27 = vld [vmem:[#allocation8 + $0xf0] sm:$0xff]  ;;  %v1655_v30 = vcombine.low %v393_v18, %v397_v19  ;;  %v1657_v31 = vcombine.low %v394_v20, %v398_v21 }
  0xa7   : > { %v1692_v61 = vcombine.high %v431_v55, %v435_v56  ;;  %v1694_v62 = vcombine.high %v432_v57, %v436_v58  ;;  %v1691_v4 = vcombine.low %v431_v55, %v435_v56  ;;  %v1693_v6 = vcombine.low %v432_v57, %v436_v58  ;;  %v402_v28 = vld [vmem:[#allocation8 + $0xd8] sm:$0xff]  ;;  %v409_v34 = vld [vmem:[#allocation8 + $0x110] sm:$0xff]  ;;  %v311_v3 = vld [vmem:[#allocation7] sm:$0xff] }
  0xa8   : > { %766 = vmatpush1.bf16.msra.mxu0 %v1659_v35  ;;  %807 = vmatpush1.bf16.msra.mxu1 %v1661_v36  ;;  %v406_v29 = vld [vmem:[#allocation8 + $0xf8] sm:$0xff]  ;;  %v1664_v32 = vcombine.high %v401_v26, %v405_v27  ;;  %v413_v35 = vld [vmem:[#allocation8 + $0x130] sm:$0xff]  ;;  %v312_v5 = vld [vmem:[#allocation7 + $0x8] sm:$0xff] }
  0xa9   : > { %767 = vmatprep.subr.bf16.mxu0 %v1668_v37  ;;  %808 = vmatprep.subr.bf16.mxu1 %v1670_v38  ;;  %v1666_v33 = vcombine.high %v402_v28, %v406_v29  ;;  %v410_v36 = vld [vmem:[#allocation8 + $0x118] sm:$0xff]  ;;  %v1663_v38 = vcombine.low %v401_v26, %v405_v27  ;;  %v1665_v39 = vcombine.low %v402_v28, %v406_v29  ;;  %v417_v42 = vld [vmem:[#allocation8 + $0x150] sm:$0xff]  ;;  %v319_v12 = vld [vmem:[#allocation7 + $0x40] sm:$0xff] }
  0xaa   : > { %v414_v37 = vld [vmem:[#allocation8 + $0x138] sm:$0xff]  ;;  %v1672_v40 = vcombine.high %v409_v34, %v413_v35  ;;  %v425_v50 = vld [vmem:[#allocation8 + $0x190] sm:$0xff]  ;;  %v323_v13 = vld [vmem:[#allocation7 + $0x60] sm:$0xff] }
  0xab   : > { %v1674_v41 = vcombine.high %v410_v36, %v414_v37  ;;  %v1673_v47 = vcombine.low %v410_v36, %v414_v37  ;;  %v433_v58 = vld [vmem:[#allocation8 + $0x1d0] sm:$0xff]  ;;  %v1708_v18 = vcombine.high %v319_v12, %v323_v13  ;;  %v327_v20 = vld [vmem:[#allocation7 + $0x80] sm:$0xff]  ;;  %v344_v37 = vld [vmem:[#allocation7 + $0x108] sm:$0xff] }
  0xac   : > { %768 = vmatpush1.bf16.msra.mxu0 %v1667_v43  ;;  %809 = vmatpush1.bf16.msra.mxu1 %v1669_v44  ;;  %v421_v43 = vld [vmem:[#allocation8 + $0x170] sm:$0xff]  ;;  %v418_v44 = vld [vmem:[#allocation8 + $0x158] sm:$0xff]  ;;  %v331_v21 = vld [vmem:[#allocation7 + $0xa0] sm:$0xff] }
  0xad   : > { %769 = vmatprep.subr.bf16.mxu0 %v1676_v45  ;;  %810 = vmatprep.subr.bf16.mxu1 %v1678_v46  ;;  %v422_v45 = vld [vmem:[#allocation8 + $0x178] sm:$0xff]  ;;  %v1671_v46 = vcombine.low %v409_v34, %v413_v35  ;;  %v1680_v48 = vcombine.high %v417_v42, %v421_v43  ;;  %v1716_v26 = vcombine.high %v327_v20, %v331_v21  ;;  %v335_v28 = vld [vmem:[#allocation7 + $0xc0] sm:$0xff] }
  0xae   : > { %v1682_v49 = vcombine.high %v418_v44, %v422_v45  ;;  %v1681_v55 = vcombine.low %v418_v44, %v422_v45  ;;  %v339_v29 = vld [vmem:[#allocation7 + $0xe0] sm:$0xff]  ;;  %v352_v45 = vld [vmem:[#allocation7 + $0x148] sm:$0xff] }
  0xaf   : > { %v343_v35 = vld [vmem:[#allocation7 + $0x100] sm:$0xff] }
  0xb0   : > { %770 = vmatpush1.bf16.msra.mxu0 %v1675_v51  ;;  %811 = vmatpush1.bf16.msra.mxu1 %v1677_v52  ;;  %v429_v51 = vld [vmem:[#allocation8 + $0x1b0] sm:$0xff]  ;;  %v426_v52 = vld [vmem:[#allocation8 + $0x198] sm:$0xff]  ;;  %v347_v36 = vld [vmem:[#allocation7 + $0x120] sm:$0xff] }
  0xb1   : > { %771 = vmatprep.subr.bf16.mxu0 %v1684_v53  ;;  %812 = vmatprep.subr.bf16.mxu1 %v1686_v54  ;;  %v430_v53 = vld [vmem:[#allocation8 + $0x1b8] sm:$0xff]  ;;  %v1679_v54 = vcombine.low %v417_v42, %v421_v43  ;;  %v1688_v56 = vcombine.high %v425_v50, %v429_v51  ;;  %v351_v43 = vld [vmem:[#allocation7 + $0x140] sm:$0xff] }
  0xb2   : > { %v1690_v57 = vcombine.high %v426_v52, %v430_v53  ;;  %v1689_v63 = vcombine.low %v426_v52, %v430_v53  ;;  %v355_v44 = vld [vmem:[#allocation7 + $0x160] sm:$0xff]  ;;  %v360_v53 = vld [vmem:[#allocation7 + $0x188] sm:$0xff] }
  0xb3   : > { %v363_v52 = vld [vmem:[#allocation7 + $0x1a0] sm:$0xff] }
  0xb4   : > { %772 = vmatpush1.bf16.msra.mxu0 %v1683_v59  ;;  %813 = vmatpush1.bf16.msra.mxu1 %v1685_v60  ;;  %v437_v59 = vld [vmem:[#allocation8 + $0x1f0] sm:$0xff]  ;;  %v434_v60 = vld [vmem:[#allocation8 + $0x1d8] sm:$0xff] }
  0xb5   : > { %773 = vmatprep.subr.bf16.mxu0 %v1692_v61  ;;  %814 = vmatprep.subr.bf16.mxu1 %v1694_v62  ;;  %v438_v61 = vld [vmem:[#allocation8 + $0x1f8] sm:$0xff]  ;;  %v1687_v62 = vcombine.low %v425_v50, %v429_v51  ;;  %v1696_v1 = vcombine.high %v433_v58, %v437_v59  ;;  %v359_v51 = vld [vmem:[#allocation7 + $0x180] sm:$0xff] }
  0xb6   : > { %v1698_v2 = vcombine.high %v434_v60, %v438_v61 }
  0xb8   : > { %774 = vmatpush1.bf16.msra.mxu0 %v1691_v4  ;;  %815 = vmatpush1.bf16.msra.mxu1 %v1693_v6  ;;  %v315_v4 = vld [vmem:[#allocation7 + $0x20] sm:$0xff]  ;;  %v316_v6 = vld [vmem:[#allocation7 + $0x28] sm:$0xff] }
  0xb9   : > { %841 = vmatprep.subr.bf16.mxu0 %v1640_v7  ;;  %882 = vmatprep.subr.bf16.mxu1 %v1642_v8  ;;  %v1695_v7 = vcombine.low %v433_v58, %v437_v59  ;;  %v1697_v8 = vcombine.low %v434_v60, %v438_v61  ;;  %v1700_v9 = vcombine.high %v311_v3, %v315_v4  ;;  %v367_v59 = vld [vmem:[#allocation7 + $0x1c0] sm:$0xff]  ;;  %v368_v61 = vld [vmem:[#allocation7 + $0x1c8] sm:$0xff] }
  0xba   : > { %v1702_v10 = vcombine.high %v312_v5, %v316_v6  ;;  %v371_v60 = vld [vmem:[#allocation7 + $0x1e0] sm:$0xff] }
  0xbb   : > { %792 = vmatmul.mubr.bf16.vlgmr.msra.gmra.mrb[0].mxu0 %v2314_v11  ;;  %833 = vmatmul.mubr.bf16.vlgmr.msra.gmra.mrb[0].mxu1 %v2314_v11 }
  0xbc   : > { %842 = vmatpush1.bf16.msra.mxu0 %v1639_v14  ;;  %883 = vmatpush1.bf16.msra.mxu1 %v1641_v15  ;;  %v320_v14 = vld [vmem:[#allocation7 + $0x48] sm:$0xff] }
  0xbd   : > { %843 = vmatprep.subr.bf16.mxu0 %v1648_v16  ;;  %884 = vmatprep.subr.bf16.mxu1 %v1650_v17  ;;  %v324_v15 = vld [vmem:[#allocation7 + $0x68] sm:$0xff]  ;;  %v1699_v16 = vcombine.low %v311_v3, %v315_v4  ;;  %v1701_v17 = vcombine.low %v312_v5, %v316_v6  ;;  %v313_v4 = vld [vmem:[#allocation7 + $0x10] sm:$0xff]  ;;  %v314_v6 = vld [vmem:[#allocation7 + $0x18] sm:$0xff] }
  0xbe   : > { %873 = vmatprep.mubr.bf16.mxu0 %v2054_v0  ;;  %914 = vmatprep.mubr.bf16.mxu1 %v2054_v0  ;;  %v1710_v19 = vcombine.high %v320_v14, %v324_v15  ;;  %v317_v5 = vld [vmem:[#allocation7 + $0x30] sm:$0xff] }
  0xc0   : > { %844 = vmatpush1.bf16.msra.mxu0 %v1647_v22  ;;  %885 = vmatpush1.bf16.msra.mxu1 %v1649_v23  ;;  %v328_v22 = vld [vmem:[#allocation7 + $0x88] sm:$0xff] }
  0xc1   : > { %845 = vmatprep.subr.bf16.mxu0 %v1656_v24  ;;  %886 = vmatprep.subr.bf16.mxu1 %v1658_v25  ;;  %v332_v23 = vld [vmem:[#allocation7 + $0xa8] sm:$0xff]  ;;  %v1707_v24 = vcombine.low %v319_v12, %v323_v13  ;;  %v1709_v25 = vcombine.low %v320_v14, %v324_v15  ;;  %v1704_v12 = vcombine.high %v313_v4, %v317_v5  ;;  %v321_v14 = vld [vmem:[#allocation7 + $0x50] sm:$0xff] }
  0xc2   : > { %v1718_v27 = vcombine.high %v328_v22, %v332_v23  ;;  %v325_v15 = vld [vmem:[#allocation7 + $0x70] sm:$0xff] }
  0xc4   : > { %846 = vmatpush1.bf16.msra.mxu0 %v1655_v30  ;;  %887 = vmatpush1.bf16.msra.mxu1 %v1657_v31  ;;  %v336_v30 = vld [vmem:[#allocation7 + $0xc8] sm:$0xff] }
  0xc5   : > { %847 = vmatprep.subr.bf16.mxu0 %v1664_v32  ;;  %888 = vmatprep.subr.bf16.mxu1 %v1666_v33  ;;  %v340_v31 = vld [vmem:[#allocation7 + $0xe8] sm:$0xff]  ;;  %v1715_v32 = vcombine.low %v327_v20, %v331_v21  ;;  %v1724_v33 = vcombine.high %v335_v28, %v339_v29  ;;  %v1712_v21 = vcombine.high %v321_v14, %v325_v15 }
  0xc6   : > { %v1726_v34 = vcombine.high %v336_v30, %v340_v31 }
  0xc8   : > { %848 = vmatpush1.bf16.msra.mxu0 %v1663_v38  ;;  %889 = vmatpush1.bf16.msra.mxu1 %v1665_v39  ;;  %v348_v38 = vld [vmem:[#allocation7 + $0x128] sm:$0xff]  ;;  %v1723_v39 = vcombine.low %v335_v28, %v339_v29 }
  0xc9   : > { %849 = vmatprep.subr.bf16.mxu0 %v1672_v40  ;;  %890 = vmatprep.subr.bf16.mxu1 %v1674_v41  ;;  %v1725_v40 = vcombine.low %v336_v30, %v340_v31  ;;  %v1732_v41 = vcombine.high %v343_v35, %v347_v36  ;;  %v1734_v42 = vcombine.high %v344_v37, %v348_v38  ;;  %v337_v31 = vld [vmem:[#allocation7 + $0xd0] sm:$0xff] }
  0xcc   : > { %850 = vmatpush1.bf16.msra.mxu0 %v1671_v46  ;;  %891 = vmatpush1.bf16.msra.mxu1 %v1673_v47  ;;  %v356_v46 = vld [vmem:[#allocation7 + $0x168] sm:$0xff]  ;;  %v1731_v47 = vcombine.low %v343_v35, %v347_v36 }
  0xcd   : > { %851 = vmatprep.subr.bf16.mxu0 %v1680_v48  ;;  %892 = vmatprep.subr.bf16.mxu1 %v1682_v49  ;;  %v1733_v48 = vcombine.low %v344_v37, %v348_v38  ;;  %v1740_v49 = vcombine.high %v351_v43, %v355_v44  ;;  %v1742_v50 = vcombine.high %v352_v45, %v356_v46  ;;  %v345_v38 = vld [vmem:[#allocation7 + $0x110] sm:$0xff] }
  0xd0   : > { %852 = vmatpush1.bf16.msra.mxu0 %v1679_v54  ;;  %893 = vmatpush1.bf16.msra.mxu1 %v1681_v55  ;;  %v364_v54 = vld [vmem:[#allocation7 + $0x1a8] sm:$0xff]  ;;  %v1739_v55 = vcombine.low %v351_v43, %v355_v44 }
  0xd1   : > { %853 = vmatprep.subr.bf16.mxu0 %v1688_v56  ;;  %894 = vmatprep.subr.bf16.mxu1 %v1690_v57  ;;  %v1741_v56 = vcombine.low %v352_v45, %v356_v46  ;;  %v1748_v57 = vcombine.high %v359_v51, %v363_v52  ;;  %v1750_v58 = vcombine.high %v360_v53, %v364_v54  ;;  %v353_v45 = vld [vmem:[#allocation7 + $0x150] sm:$0xff] }
  0xd2   : > { %v357_v46 = vld [vmem:[#allocation7 + $0x170] sm:$0xff] }
  0xd4   : > { %854 = vmatpush1.bf16.msra.mxu0 %v1687_v62  ;;  %895 = vmatpush1.bf16.msra.mxu1 %v1689_v63  ;;  %v372_v62 = vld [vmem:[#allocation7 + $0x1e8] sm:$0xff]  ;;  %v1747_v63 = vcombine.low %v359_v51, %v363_v52  ;;  %v1744_v51 = vcombine.high %v353_v45, %v357_v46 }
  0xd5   : > { %855 = vmatprep.subr.bf16.mxu0 %v1696_v1  ;;  %896 = vmatprep.subr.bf16.mxu1 %v1698_v2  ;;  %v1749_v1 = vcombine.low %v360_v53, %v364_v54  ;;  %v1756_v2 = vcombine.high %v367_v59, %v371_v60  ;;  %v1758_v3 = vcombine.high %v368_v61, %v372_v62  ;;  %v361_v53 = vld [vmem:[#allocation7 + $0x190] sm:$0xff] }
  0xd6   : > { %v365_v54 = vld [vmem:[#allocation7 + $0x1b0] sm:$0xff] }
  0xd8   : > { %856 = vmatpush1.bf16.msra.mxu0 %v1695_v7  ;;  %897 = vmatpush1.bf16.msra.mxu1 %v1697_v8  ;;  %v318_v7 = vld [vmem:[#allocation7 + $0x38] sm:$0xff]  ;;  %v1755_v8 = vcombine.low %v367_v59, %v371_v60  ;;  %v1752_v59 = vcombine.high %v361_v53, %v365_v54 }
  0xd9   : > { %1243 = vmatprep.subr.bf16.mxu0 %v1700_v9  ;;  %1284 = vmatprep.subr.bf16.mxu1 %v1702_v10  ;;  %v307_v9 = vld [vmem:[%s2290_s28] sm:$0xff]  ;;  %v1757_v10 = vcombine.low %v368_v61, %v372_v62  ;;  %v1706_v13 = vcombine.high %v314_v6, %v318_v7  ;;  %v1705_v20 = vcombine.low %v314_v6, %v318_v7  ;;  %v369_v61 = vld [vmem:[#allocation7 + $0x1d0] sm:$0xff] }
  0xda   : > { %v373_v62 = vld [vmem:[#allocation7 + $0x1f0] sm:$0xff] }
  0xdb   : > { %874 = vmatmul.mubr.bf16.vlgmr.msra.gmra.mrb[4].mxu0 %v2314_v11  ;;  %915 = vmatmul.mubr.bf16.vlgmr.msra.gmra.mrb[4].mxu1 %v2314_v11  ;;  %v1717_v11 = vcombine.low %v328_v22, %v332_v23  ;;  %v329_v23 = vld [vmem:[#allocation7 + $0x90] sm:$0xff]  ;;  %v1759_v6 = vcombine.low %v369_v61, %v373_v62 }
  0xdc   : > { %1244 = vmatpush1.bf16.msra.mxu0 %v1699_v16  ;;  %1285 = vmatpush1.bf16.msra.mxu1 %v1701_v17  ;;  %v2325_v16 = vpack.c.bf16 %v307_v9, %v307_v9  ;;  %v322_v17 = vld [vmem:[#allocation7 + $0x58] sm:$0xff] }
  0xdd   : > { %1245 = vmatprep.subr.bf16.mxu0 %v1708_v18  ;;  %1286 = vmatprep.subr.bf16.mxu1 %v1710_v19  ;;  %v326_v18 = vld [vmem:[#allocation7 + $0x78] sm:$0xff]  ;;  %v1703_v19 = vcombine.low %v313_v4, %v317_v5  ;;  %v1760_v4 = vcombine.high %v369_v61, %v373_v62 }
  0xde   : > { %1275 = vmatprep.mubr.bf16.mxu0 %v2054_v0  ;;  %1316 = vmatprep.mubr.bf16.mxu1 %v2054_v0  ;;  %v1714_v22 = vcombine.high %v322_v17, %v326_v18  ;;  %v1713_v28 = vcombine.low %v322_v17, %v326_v18 }
  0xe0   : > { %1246 = vmatpush1.bf16.msra.mxu0 %v1707_v24  ;;  %1287 = vmatpush1.bf16.msra.mxu1 %v1709_v25  ;;  %v333_v24 = vld [vmem:[#allocation7 + $0xb0] sm:$0xff]  ;;  %v330_v25 = vld [vmem:[#allocation7 + $0x98] sm:$0xff] }
  0xe1   : > { %1247 = vmatprep.subr.bf16.mxu0 %v1716_v26  ;;  %1288 = vmatprep.subr.bf16.mxu1 %v1718_v27  ;;  %v334_v26 = vld [vmem:[#allocation7 + $0xb8] sm:$0xff]  ;;  %v1711_v27 = vcombine.low %v321_v14, %v325_v15  ;;  %v1720_v29 = vcombine.high %v329_v23, %v333_v24 }
  0xe2   : > { %v1722_v30 = vcombine.high %v330_v25, %v334_v26  ;;  %v1721_v35 = vcombine.low %v330_v25, %v334_v26  ;;  %v1409_v26 = vlaneseq }
  0xe4   : > { %1248 = vmatpush1.bf16.msra.mxu0 %v1715_v32  ;;  %1289 = vmatpush1.bf16.msra.mxu1 %v1717_v11  ;;  %v341_v32 = vld [vmem:[#allocation7 + $0xf0] sm:$0xff]  ;;  %v338_v11 = vld [vmem:[#allocation7 + $0xd8] sm:$0xff] }
  0xe5   : > { %1249 = vmatprep.subr.bf16.mxu0 %v1724_v33  ;;  %1290 = vmatprep.subr.bf16.mxu1 %v1726_v34  ;;  %v342_v33 = vld [vmem:[#allocation7 + $0xf8] sm:$0xff]  ;;  %v1719_v34 = vcombine.low %v329_v23, %v333_v24  ;;  %v1728_v36 = vcombine.high %v337_v31, %v341_v32 }
  0xe6   : > { %v1730_v37 = vcombine.high %v338_v11, %v342_v33  ;;  %v1729_v43 = vcombine.low %v338_v11, %v342_v33 }
  0xe8   : > { %1250 = vmatpush1.bf16.msra.mxu0 %v1723_v39  ;;  %1291 = vmatpush1.bf16.msra.mxu1 %v1725_v40  ;;  %v349_v39 = vld [vmem:[#allocation7 + $0x130] sm:$0xff]  ;;  %v346_v40 = vld [vmem:[#allocation7 + $0x118] sm:$0xff] }
  0xe9   : > { %1251 = vmatprep.subr.bf16.mxu0 %v1732_v41  ;;  %1292 = vmatprep.subr.bf16.mxu1 %v1734_v42  ;;  %v350_v41 = vld [vmem:[#allocation7 + $0x138] sm:$0xff]  ;;  %v1727_v42 = vcombine.low %v337_v31, %v341_v32  ;;  %v1736_v44 = vcombine.high %v345_v38, %v349_v39 }
  0xec   : > { %1252 = vmatpush1.bf16.msra.mxu0 %v1731_v47  ;;  %1293 = vmatpush1.bf16.msra.mxu1 %v1733_v48  ;;  %v354_v47 = vld [vmem:[#allocation7 + $0x158] sm:$0xff] }
  0xed   : > { %1253 = vmatprep.subr.bf16.mxu0 %v1740_v49  ;;  %1294 = vmatprep.subr.bf16.mxu1 %v1742_v50  ;;  %v358_v48 = vld [vmem:[#allocation7 + $0x178] sm:$0xff]  ;;  %v1735_v49 = vcombine.low %v345_v38, %v349_v39  ;;  %v1737_v50 = vcombine.low %v346_v40, %v350_v41 }
  0xee   : > { %v1746_v52 = vcombine.high %v354_v47, %v358_v48 }
  0xf0   : > { %1254 = vmatpush1.bf16.msra.mxu0 %v1739_v55  ;;  %1295 = vmatpush1.bf16.msra.mxu1 %v1741_v56  ;;  %v362_v55 = vld [vmem:[#allocation7 + $0x198] sm:$0xff] }
  0xf1   : > { %1255 = vmatprep.subr.bf16.mxu0 %v1748_v57  ;;  %1296 = vmatprep.subr.bf16.mxu1 %v1750_v58  ;;  %v366_v56 = vld [vmem:[#allocation7 + $0x1b8] sm:$0xff]  ;;  %v1743_v57 = vcombine.low %v353_v45, %v357_v46  ;;  %v1745_v58 = vcombine.low %v354_v47, %v358_v48 }
  0xf2   : > { %v1754_v60 = vcombine.high %v362_v55, %v366_v56 }
  0xf4   : > { %1256 = vmatpush1.bf16.msra.mxu0 %v1747_v63  ;;  %1297 = vmatpush1.bf16.msra.mxu1 %v1749_v1  ;;  %v370_v63 = vld [vmem:[#allocation7 + $0x1d8] sm:$0xff] }
  0xf5   : > { %1257 = vmatprep.subr.bf16.mxu0 %v1756_v2  ;;  %1298 = vmatprep.subr.bf16.mxu1 %v1758_v3  ;;  %v374_v1 = vld [vmem:[#allocation7 + $0x1f8] sm:$0xff]  ;;  %v1751_v2 = vcombine.low %v361_v53, %v365_v54  ;;  %v1753_v3 = vcombine.low %v362_v55, %v366_v56 }
  0xf6   : > { %v1762_v5 = vcombine.high %v370_v63, %v374_v1  ;;  %v1761_v7 = vcombine.low %v370_v63, %v374_v1 }
  0xf8   : > { %1258 = vmatpush1.bf16.msra.mxu0 %v1755_v8  ;;  %1299 = vmatpush1.bf16.msra.mxu1 %v1757_v10 }
  0xf9   : > { %1325 = vmatprep.subr.bf16.mxu0 %v1704_v12  ;;  %1366 = vmatprep.subr.bf16.mxu1 %v1706_v13 }
  0xfb   : > { %1276 = vmatmul.mubr.bf16.vlgmr.msra.gmra.mrb[8].mxu0 %v2325_v16  ;;  %1317 = vmatmul.mubr.bf16.vlgmr.msra.gmra.mrb[8].mxu1 %v2325_v16 }
  0xfc   : > { %1326 = vmatpush1.bf16.msra.mxu0 %v1703_v19  ;;  %1367 = vmatpush1.bf16.msra.mxu1 %v1705_v20 }
  0xfd   : > { %1327 = vmatprep.subr.bf16.mxu0 %v1712_v21  ;;  %1368 = vmatprep.subr.bf16.mxu1 %v1714_v22 }
  0xfe   : > { %1357 = vmatprep.mubr.bf16.mxu0 %v2054_v0  ;;  %1398 = vmatprep.mubr.bf16.mxu1 %v2054_v0  ;;  %v1738_v0 = vcombine.high %v346_v40, %v350_v41 }
 0x100   : > { %1328 = vmatpush1.bf16.msra.mxu0 %v1711_v27  ;;  %1369 = vmatpush1.bf16.msra.mxu1 %v1713_v28  ;;  %v1410_v27 = vshrl.u32 %v1409_v26, 7  ;;  %v1407_v28 = vld [vmem:[%s2396_s4] sm:$0xff] }
 0x101   : > { %1329 = vmatprep.subr.bf16.mxu0 %v1720_v29  ;;  %1370 = vmatprep.subr.bf16.mxu1 %v1722_v30 }
 0x102   : > { %v1419_v29 = vsub.s32 2, %v1410_v27  ;;  %v1415_v30 = vsub.s32 1, %v1410_v27  ;;  %v1423_v31 = vsub.s32 3, %v1410_v27  ;;  %v1435_v53 = vsub.s32 6, %v1410_v27 }
 0x103   : > { %v1431_v54 = vsub.s32 5, %v1410_v27  ;;  %v1439_v55 = vsub.s32 7, %v1410_v27 }
 0x104   : > { %1330 = vmatpush1.bf16.msra.mxu0 %v1719_v34  ;;  %1371 = vmatpush1.bf16.msra.mxu1 %v1721_v35  ;;  %v1420_v33 = vrot.slane %v1407_v28, %v1419_v29  ;;  %v1416_v34 = vrot.slane %v1407_v28, %v1415_v30  ;;  %v1424_v38 = vrot.slane %v1407_v28, %v1423_v31 }
 0x105   : > { %1331 = vmatprep.subr.bf16.mxu0 %v1728_v36  ;;  %1372 = vmatprep.subr.bf16.mxu1 %v1730_v37  ;;  %v1440_v63 = vrot.slane %v1407_v28, %v1439_v55 }
 0x108   : > { %1332 = vmatpush1.bf16.msra.mxu0 %v1727_v42  ;;  %1373 = vmatpush1.bf16.msra.mxu1 %v1729_v43 }
 0x109   : > { %1333 = vmatprep.subr.bf16.mxu0 %v1736_v44  ;;  %1374 = vmatprep.subr.bf16.mxu1 %v1738_v0 }
 0x10c   : > { %1334 = vmatpush1.bf16.msra.mxu0 %v1735_v49  ;;  %1375 = vmatpush1.bf16.msra.mxu1 %v1737_v50 }
 0x10d   : > { %1335 = vmatprep.subr.bf16.mxu0 %v1744_v51  ;;  %1376 = vmatprep.subr.bf16.mxu1 %v1746_v52  ;;  %v1427_v52 = vsub.s32 4, %v1410_v27 }
 0x10f   : > { %v1428_v56 = vrot.slane %v1407_v28, %v1427_v52 }
 0x110   : > { %1336 = vmatpush1.bf16.msra.mxu0 %v1743_v57  ;;  %1377 = vmatpush1.bf16.msra.mxu1 %v1745_v58  ;;  %v1436_v58 = vrot.slane %v1407_v28, %v1435_v53 }
 0x111   : > { %1337 = vmatprep.subr.bf16.mxu0 %v1752_v59  ;;  %1378 = vmatprep.subr.bf16.mxu1 %v1754_v60  ;;  %v1432_v59 = vrot.slane %v1407_v28, %v1431_v54 }
 0x114   : > { %1338 = vmatpush1.bf16.msra.mxu0 %v1751_v2  ;;  %1379 = vmatpush1.bf16.msra.mxu1 %v1753_v3 }
 0x115   : > { %1339 = vmatprep.subr.bf16.mxu0 %v1760_v4  ;;  %1380 = vmatprep.subr.bf16.mxu1 %v1762_v5 }
 0x118   : > { %1340 = vmatpush1.bf16.msra.mxu0 %v1759_v6  ;;  %1381 = vmatpush1.bf16.msra.mxu1 %v1761_v7 }
 0x11b   : > { %1358 = vmatmul.mubr.bf16.vlgmr.msra.gmra.mrb[12].mxu0 %v2325_v16  ;;  %1399 = vmatmul.mubr.bf16.vlgmr.msra.gmra.mrb[12].mxu1 %v2325_v16  ;;  %v1411_v16 = vsub.s32 0, %v1410_v27 }
 0x11d   : > { %v1412_v32 = vrot.slane %v1407_v28, %v1411_v16 }
 0x18e   : > { %v793_v8 = vpop.f32.mrb[0].mxu0  ;;  %v834_v9 = vpop.f32.mrb[0].mxu1 }
 0x18f   : > { %v795_v10 = vpop.f32.mrb[1].mxu0  ;;  %v836_v12 = vpop.f32.mrb[1].mxu1 }
 0x190   : > { %v797_v13 = vpop.f32.mrb[2].mxu0  ;;  %v838_v14 = vpop.f32.mrb[2].mxu1 }
 0x191   : > { %v798_v15 = vpop.f32.mrb[3].mxu0  ;;  %v839_v17 = vpop.f32.mrb[3].mxu1 }
 0x1ae   : > { %v875_v18 = vpop.f32.mrb[4].mxu0  ;;  %v916_v19 = vpop.f32.mrb[4].mxu1 }
 0x1af   : > { %v877_v20 = vpop.f32.mrb[5].mxu0  ;;  %v918_v21 = vpop.f32.mrb[5].mxu1 }
 0x1b0   : > { %v879_v22 = vpop.f32.mrb[6].mxu0  ;;  %v920_v23 = vpop.f32.mrb[6].mxu1 }
 0x1b1   : > { %v880_v24 = vpop.f32.mrb[7].mxu0  ;;  %v921_v25 = vpop.f32.mrb[7].mxu1 }
 0x1ce   : > { %v1277_v11 = vpop.f32.mrb[8].mxu0  ;;  %v1318_v36 = vpop.f32.mrb[8].mxu1 }
 0x1cf   : > { %v1278_v35 = vadd.f32 %v1277_v11, %v793_v8  ;;  %v1279_v37 = vpop.f32.mrb[9].mxu0  ;;  %v1319_v39 = vadd.f32 %v1318_v36, %v834_v9  ;;  %v1320_v41 = vpop.f32.mrb[9].mxu1 }
 0x1d0   : > { %v1280_v40 = vadd.f32 %v1279_v37, %v795_v10  ;;  %v1281_v42 = vpop.f32.mrb[10].mxu0  ;;  %v1321_v44 = vadd.f32 %v1320_v41, %v836_v12  ;;  %v1322_v0 = vpop.f32.mrb[10].mxu1 }
 0x1d1   : > { %v1449_v43 = vadd.f32 %v1412_v32, %v1278_v35  ;;  %v1282_v45 = vpop.f32.mrb[11].mxu0  ;;  %v1451_v46 = vadd.f32 %v1420_v33, %v1319_v39  ;;  %v1323_v48 = vpop.f32.mrb[11].mxu1 }
 0x1d2   : > { %v1450_v47 = vadd.f32 %v1416_v34, %v1280_v40  ;;  %v1452_v49 = vadd.f32 %v1424_v38, %v1321_v44 }
 0x1d4   : > { %v1772_v50 = vpack.c.bf16 %v1450_v47, %v1449_v43  ;;  %v1773_v51 = vpack.c.bf16 %v1452_v49, %v1451_v46 }
 0x1d6   : > { %1489 = vst [vmem:[%s2337_s30] sm:$0xff] %v1772_v50  ;;  %1490 = vst [vmem:[%s2337_s30 + $0x8] sm:$0xff] %v1773_v51 }
 0x1ee   : > { %v1359_v57 = vpop.f32.mrb[12].mxu0  ;;  %v1400_v61 = vpop.f32.mrb[12].mxu1 }
 0x1ef   : > { %v1360_v60 = vadd.f32 %v1359_v57, %v875_v18  ;;  %v1361_v62 = vpop.f32.mrb[13].mxu0  ;;  %v1401_v1 = vadd.f32 %v1400_v61, %v916_v19  ;;  %v1402_v3 = vpop.f32.mrb[13].mxu1 }
 0x1f0   : > { %v1362_v2 = vadd.f32 %v1361_v62, %v877_v20  ;;  %v1363_v4 = vpop.f32.mrb[14].mxu0  ;;  %v1403_v6 = vadd.f32 %v1402_v3, %v918_v21  ;;  %v1404_v7 = vpop.f32.mrb[14].mxu1 }
 0x1f1   : > { %v1453_v5 = vadd.f32 %v1428_v56, %v1360_v60  ;;  %v1364_v8 = vpop.f32.mrb[15].mxu0  ;;  %v1455_v9 = vadd.f32 %v1436_v58, %v1401_v1  ;;  %v1405_v12 = vpop.f32.mrb[15].mxu1 }
 0x1f2   : > { %v1454_v10 = vadd.f32 %v1432_v59, %v1362_v2  ;;  %v1456_v13 = vadd.f32 %v1440_v63, %v1403_v6 }
 0x1f4   : > { %v1774_v14 = vpack.c.bf16 %v1454_v10, %v1453_v5  ;;  %v1775_v15 = vpack.c.bf16 %v1456_v13, %v1455_v9 }
 0x1f6   : > { %1491 = vst [vmem:[%s2337_s30 + $0x10] sm:$0xff] %v1774_v14  ;;  %1492 = vst [vmem:[%s2337_s30 + $0x18] sm:$0xff] %v1775_v15 }
 0x1f7   : > { %1981 = shalt.err (!%p1978_p7)
}
 0x1f8   : > { %s1982_s17 = scalar_lea.hbm %s2346_s8, 512  ;;  %s1986_s26 = scalar_lea.hbm %s2397_s5, 1024 }
 0x1f9   : > { %p1983_p1 = scmp.ne.s32.totalorder %s2346_s8, %s1982_s17  ;;  %p1987_p0 = scmp.lt.u32.totalorder %s2346_s8, %s2397_s5 }
 0x1fa   : > { %p1988_p9 = scmp.lt.u32.totalorder %s1986_s26, %s1982_s17  ;;  %p1990_p2 = scmp.lt.u32.totalorder %s1982_s17, %s2346_s8 }
 0x1fb   : > { %p1984_p8 = pnand %p1983_p1, %p2419_p13 }
 0x1fc   : > { %p1989_p12 = por %p1988_p9, %p1987_p0 }
 0x1fd   : > { %p1985_p11 = pneg %p1984_p8 }
 0x1fe   : > { %p1991_p6 = por %p1990_p2, %p1989_p12 }
 0x200   : > { %p1992_p10 = pnand %p1991_p6, %p1985_p11 }
 0x202   : > { %1995 = shalt.err (!%p1992_p10)
}
 0x203   : > { %1789 = dma.vmem_to_hbm [thread:$0]  (%p2419_p13), %s2348_s12, 512, %s2346_s8, %s1494_s10  }
 0x204 PF: > { %s1520_s16 = sand.u32 1, %s2034_s18   ;;  %p2420_p4 = scmp.ne.s32.totalorder %s2405_s25, 0 }
 0x205   : > { %p2421_p5 = scmp.ge.s32.totalorder %s2046_s21, 2  ;;  %s1521_s7 = scalar_lea.sflag [#allocation4], %s1520_s16 }
 0x207   : > { %p1806_p3 = pnand %p2421_p5, %p2420_p4 }
 0x209   : > { %2029 = dma.done.wait (!%p1806_p3), %s1521_s7, 512  }
 0x20a   : > { %2031 = vsyncadd (!%p1806_p3), %s1521_s7, 4294966784  ;;  %p22_p7 = scmp.ge.s32.totalorder %s2196_s14, 4   ;;  %s2422_s18 = smov %s2038_s19 }
 0x20b   : > { %s2423_s19 = smov %s2042_s20  ;;  %s2424_s20 = smov %s2212_s27 }
 0x20c   : > { %s2425_s21 = smov %s2196_s14  ;;  %24 = sbr.rel (!%p22_p7) target bundleno = 11 (0xb), region = 106 }
 0x213   :  { %1526 = vsyncpa [#allocation3], 1 }
 0x214   :  { %1528 = vsyncpa [#allocation3 + $0x1], 1 }
 0x215   :  { %1529 = vsyncpa [#allocation6], 1 }
 0x216   :  { %1531 = vsyncpa [#allocation6 + $0x1], 1 }
 0x217   :  { %1532 = vsyncpa [#allocation9], 1 }
 0x218   :  { %1533 = vsyncpa [#allocation4], 1 }
 0x219   :  { %1535 = vsyncpa [#allocation4 + $0x1], 1 }

</bundles_post_ra>
